<compile_context>
chip_gen: v5e
topology: v5e:2x2
jax: 0.10.0
libtpu: 0.0.40
codegen_flags: <defaults>
</compile_context>

<pallas_src>
import jax
import jax.numpy as jnp
from jax.experimental import pallas as pl
from jax.experimental.pallas import tpu as pltpu


def dual_input_kernel(x1_ref, x2_ref, w1_ref, w2_ref, w3o1_ref, w3o2_ref, out_ref):
    """Forward pass for one batch tile (both branches), entirely in VMEM."""
    cdt = x1_ref.dtype
    tb = x1_ref.shape[0]

    # Stack the two branches along the row/sublane axis -> one tall matmul per layer
    # instead of two skinny ones (better MXU weight-stationary cadence).
    xs = jnp.concatenate([x1_ref[...], x2_ref[...]], axis=0)          # (2*tb, F)

    h1 = jnp.dot(xs, w1_ref[...], preferred_element_type=jnp.float32)  # (2*tb, 100)
    h1 = jnp.maximum(h1, 0.0).astype(cdt)
    h2 = jnp.dot(h1, w2_ref[...], preferred_element_type=jnp.float32)  # (2*tb, 50)
    h2 = jnp.maximum(h2, 0.0).astype(cdt)

    # Folded final layer:
    #   pred = relu(h2_1) @ (w3 @ wout[:rep]) + relu(h2_2) @ (w3 @ wout[rep:])
    pred = (jnp.dot(h2[:tb], w3o1_ref[...], preferred_element_type=jnp.float32)
            + jnp.dot(h2[tb:], w3o2_ref[...], preferred_element_type=jnp.float32))
    out_ref[...] = pred.astype(out_ref.dtype)


def dual_input_net(x1, x2, params, *, block_b=512, compute_dtype=jnp.bfloat16):
    w1, w2, w3, wout = params["w1"], params["w2"], params["w3"], params["wout"]
    rep_dim = w3.shape[1]

    # --- host-side algebraic folding (exact: last encoder layer has no activation) ---
    w3o1 = jnp.dot(w3, wout[:rep_dim, :], precision=jax.lax.Precision.HIGHEST)  # (50, 1)
    w3o2 = jnp.dot(w3, wout[rep_dim:, :], precision=jax.lax.Precision.HIGHEST)  # (50, 1)

    w1c, w2c = w1.astype(compute_dtype), w2.astype(compute_dtype)
    w3o1c, w3o2c = w3o1.astype(compute_dtype), w3o2.astype(compute_dtype)
    x1c, x2c = x1.astype(compute_dtype), x2.astype(compute_dtype)

    B, F = x1.shape
    H1, H2 = w1.shape[1], w2.shape[1]

    # --- batch tiling ---------------------------------------------------------------
    if B <= block_b:
        tb = B                       # single tile; full-dim block is always legal
    else:
        tb = max(8, (block_b // 8) * 8)   # sublane-aligned tile for the gridded case
    grid_b = pl.cdiv(B, tb)
    Bp = grid_b * tb
    if Bp != B:                      # pad so every tile is full / aligned
        pad = ((0, Bp - B), (0, 0))
        x1c = jnp.pad(x1c, pad)
        x2c = jnp.pad(x2c, pad)

    itemsize = jnp.dtype(compute_dtype).itemsize
    cost = pl.CostEstimate(
        flops=2 * 2 * Bp * (F * H1 + H1 * H2 + H2 * 1),
        transcendentals=0,
        bytes_accessed=(2 * Bp * F * itemsize
                        + int(w1c.size + w2c.size + w3o1c.size + w3o2c.size) * itemsize
                        + Bp * 4),
    )

    const = lambda a: pl.BlockSpec(a.shape, lambda i: (0, 0))  # VMEM-resident weights

    out = pl.pallas_call(
        dual_input_kernel,
        out_shape=jax.ShapeDtypeStruct((Bp, 1), jnp.float32),
        grid=(grid_b,),
        in_specs=[
            pl.BlockSpec((tb, F), lambda i: (i, 0)),   # x1 batch tile
            pl.BlockSpec((tb, F), lambda i: (i, 0)),   # x2 batch tile
            const(w1c), const(w2c), const(w3o1c), const(w3o2c),
        ],
        out_specs=pl.BlockSpec((tb, 1), lambda i: (i, 0)),
        compiler_params=pltpu.CompilerParams(
            dimension_semantics=("parallel",),          # megacore-shard batch axis (v7x)
        ),
        cost_estimate=cost,
    )(x1c, x2c, w1c, w2c, w3o1c, w3o2c)

    return out[:B]


def init_params(key, n_features, hidden_dims=(100, 50), rep_dim=64):
    """Deterministic synthetic init. Weights stored (in, out)."""
    dims = [n_features, *hidden_dims, rep_dim]
    keys = jax.random.split(key, len(dims))
    params = {}
    for i, name in enumerate(["w1", "w2", "w3"]):
        fan_in, fan_out = dims[i], dims[i + 1]
        scale = 1.0 / jnp.sqrt(jnp.float32(fan_in))
        params[name] = jax.random.uniform(
            keys[i], (fan_in, fan_out), jnp.float32, minval=-scale, maxval=scale)
    scale = 1.0 / jnp.sqrt(jnp.float32(2 * rep_dim))
    params["wout"] = jax.random.uniform(
        keys[-1], (2 * rep_dim, 1), jnp.float32, minval=-scale, maxval=scale)
    return params


def reference_forward(x1, x2, params):
    def enc(x):
        h = jnp.maximum(x @ params["w1"], 0.0)
        h = jnp.maximum(h @ params["w2"], 0.0)
        return h @ params["w3"]
    z = jnp.concatenate([enc(x1), enc(x2)], axis=1)
    return z @ params["wout"]


if __name__ == "__main__":
    key = jax.random.PRNGKey(0)
    k_p, k_x1, k_x2, k_y1, k_y2 = jax.random.split(key, 5)

    batch, n_features = 8, 16
    params = init_params(k_p, n_features)

    # --- case 1: small batch, f32 compute path (tight semantics check) ---------------
    x1 = jax.random.normal(k_x1, (batch, n_features), jnp.float32)
    x2 = jax.random.normal(k_x2, (batch, n_features), jnp.float32)
    pred = dual_input_net(x1, x2, params, compute_dtype=jnp.float32)
    jax.block_until_ready(pred)
    ref = reference_forward(x1, x2, params)
    assert pred.shape == (batch, 1)
    assert jnp.allclose(pred, ref, atol=1e-3, rtol=1e-3), "f32 path mismatch vs reference"

    # --- case 2: gridded + padded batch, bf16 compute path (perf configuration) ------
    big_b = 200                                  # not a multiple of the tile -> exercises padding
    y1 = jax.random.normal(k_y1, (big_b, n_features), jnp.float32)
    y2 = jax.random.normal(k_y2, (big_b, n_features), jnp.float32)
    pred_big = dual_input_net(y1, y2, params, block_b=64, compute_dtype=jnp.bfloat16)
    jax.block_until_ready(pred_big)
    ref_big = reference_forward(y1, y2, params)
    assert pred_big.shape == (big_b, 1)
    # bf16 operands -> loosened tolerance (per review), f32 accumulation keeps it small.
    assert jnp.allclose(pred_big, ref_big, atol=5e-2, rtol=5e-2), "bf16 path mismatch vs reference"

    print("KERNEL_OK")
</pallas_src>

<mosaic_0001>
module attributes {stable_mosaic.version = 11 : i64} {
  func.func @dual_input_kernel(%arg0: i32, %arg1: memref<8x16xf32, #tpu.memory_space<vmem>>, %arg2: memref<8x16xf32, #tpu.memory_space<vmem>>, %arg3: memref<16x100xf32, #tpu.memory_space<vmem>>, %arg4: memref<100x50xf32, #tpu.memory_space<vmem>>, %arg5: memref<50x1xf32, #tpu.memory_space<vmem>>, %arg6: memref<50x1xf32, #tpu.memory_space<vmem>>, %arg7: memref<8x1xf32, #tpu.memory_space<vmem>>) attributes {dimension_semantics = [#tpu.dimension_semantics<parallel>], iteration_bounds = array<i64: 1>, scalar_prefetch = 0 : i64, scratch_operands = 0 : i64, tpu.core_type = #tpu.core_type<tc>, window_params = [{transform_indices = @transform_0, window_bounds = array<i64: 8, 16>}, {transform_indices = @transform_1, window_bounds = array<i64: 8, 16>}, {pipeline_mode = #tpu.pipeline_mode<synchronous>, transform_indices = @transform_2, window_bounds = array<i64: 16, 100>}, {pipeline_mode = #tpu.pipeline_mode<synchronous>, transform_indices = @transform_3, window_bounds = array<i64: 100, 50>}, {pipeline_mode = #tpu.pipeline_mode<synchronous>, transform_indices = @transform_4, window_bounds = array<i64: 50, 1>}, {pipeline_mode = #tpu.pipeline_mode<synchronous>, transform_indices = @transform_5, window_bounds = array<i64: 50, 1>}, {transform_indices = @transform_6, window_bounds = array<i64: 8, 1>}]} {
    %c0 = arith.constant 0 : index
    %c0_0 = arith.constant 0 : index
    %0 = vector.load %arg1[%c0, %c0_0] : memref<8x16xf32, #tpu.memory_space<vmem>>, vector<8x16xf32>
    %c0_1 = arith.constant 0 : index
    %c0_2 = arith.constant 0 : index
    %1 = vector.load %arg2[%c0_1, %c0_2] : memref<8x16xf32, #tpu.memory_space<vmem>>, vector<8x16xf32>
    %2 = tpu.concatenate %0, %1 in 0 : vector<8x16xf32>, vector<8x16xf32> -> vector<16x16xf32>
    %c0_3 = arith.constant 0 : index
    %c0_4 = arith.constant 0 : index
    %3 = vector.load %arg3[%c0_3, %c0_4] : memref<16x100xf32, #tpu.memory_space<vmem>>, vector<16x100xf32>
    %cst = arith.constant dense<0.000000e+00> : vector<16x100xf32>
    %4 = tpu.matmul %2, %3, %cst {dimension_numbers = #tpu.dot_dimension_numbers<[1], [0], [0], [1], [0, 0, 1, 1], [], []>} : vector<16x16xf32>, vector<16x100xf32>, vector<16x100xf32> -> vector<16x100xf32>
    %cst_5 = arith.constant 0.000000e+00 : f32
    %5 = vector.broadcast %cst_5 : f32 to vector<16x100xf32>
    %6 = arith.maximumf %4, %5 : vector<16x100xf32>
    %c0_6 = arith.constant 0 : index
    %c0_7 = arith.constant 0 : index
    %7 = vector.load %arg4[%c0_6, %c0_7] : memref<100x50xf32, #tpu.memory_space<vmem>>, vector<100x50xf32>
    %cst_8 = arith.constant dense<0.000000e+00> : vector<16x50xf32>
    %8 = tpu.matmul %6, %7, %cst_8 {dimension_numbers = #tpu.dot_dimension_numbers<[1], [0], [0], [1], [0, 0, 1, 1], [], []>} : vector<16x100xf32>, vector<100x50xf32>, vector<16x50xf32> -> vector<16x50xf32>
    %cst_9 = arith.constant 0.000000e+00 : f32
    %9 = vector.broadcast %cst_9 : f32 to vector<16x50xf32>
    %10 = arith.maximumf %8, %9 : vector<16x50xf32>
    %11 = vector.extract_strided_slice %10 {offsets = [0, 0], sizes = [8, 50], strides = [1, 1]} : vector<16x50xf32> to vector<8x50xf32>
    %c0_10 = arith.constant 0 : index
    %c0_11 = arith.constant 0 : index
    %12 = vector.load %arg5[%c0_10, %c0_11] : memref<50x1xf32, #tpu.memory_space<vmem>>, vector<50x1xf32>
    %cst_12 = arith.constant dense<0.000000e+00> : vector<8x1xf32>
    %13 = tpu.matmul %11, %12, %cst_12 {dimension_numbers = #tpu.dot_dimension_numbers<[1], [0], [0], [1], [0, 0, 1, 1], [], []>} : vector<8x50xf32>, vector<50x1xf32>, vector<8x1xf32> -> vector<8x1xf32>
    %14 = vector.extract_strided_slice %10 {offsets = [8, 0], sizes = [8, 50], strides = [1, 1]} : vector<16x50xf32> to vector<8x50xf32>
    %c0_13 = arith.constant 0 : index
    %c0_14 = arith.constant 0 : index
    %15 = vector.load %arg6[%c0_13, %c0_14] : memref<50x1xf32, #tpu.memory_space<vmem>>, vector<50x1xf32>
    %cst_15 = arith.constant dense<0.000000e+00> : vector<8x1xf32>
    %16 = tpu.matmul %14, %15, %cst_15 {dimension_numbers = #tpu.dot_dimension_numbers<[1], [0], [0], [1], [0, 0, 1, 1], [], []>} : vector<8x50xf32>, vector<50x1xf32>, vector<8x1xf32> -> vector<8x1xf32>
    %17 = arith.addf %13, %16 : vector<8x1xf32>
    %c0_16 = arith.constant 0 : index
    %c0_17 = arith.constant 0 : index
    %18 = vector.load %arg7[%c0_16, %c0_17] : memref<8x1xf32, #tpu.memory_space<vmem>>, vector<8x1xf32>
    tpu.vector_store %arg7[%c0_16, %c0_17], %17 {strides = array<i32>} : memref<8x1xf32, #tpu.memory_space<vmem>>, vector<8x1xf32>,
    return
  }
  func.func @transform_0(%arg0: i32) -> (i32, i32) {
    %c0_i32 = arith.constant 0 : i32
    %c0_i32_0 = arith.constant 0 : i32
    return %arg0, %c0_i32 : i32, i32
  }
  func.func @transform_1(%arg0: i32) -> (i32, i32) {
    %c0_i32 = arith.constant 0 : i32
    %c0_i32_0 = arith.constant 0 : i32
    return %arg0, %c0_i32 : i32, i32
  }
  func.func @transform_2(%arg0: i32) -> (i32, i32) {
    %c0_i32 = arith.constant 0 : i32
    %c0_i32_0 = arith.constant 0 : i32
    %c0_i32_1 = arith.constant 0 : i32
    return %c0_i32, %c0_i32_0 : i32, i32
  }
  func.func @transform_3(%arg0: i32) -> (i32, i32) {
    %c0_i32 = arith.constant 0 : i32
    %c0_i32_0 = arith.constant 0 : i32
    %c0_i32_1 = arith.constant 0 : i32
    return %c0_i32, %c0_i32_0 : i32, i32
  }
  func.func @transform_4(%arg0: i32) -> (i32, i32) {
    %c0_i32 = arith.constant 0 : i32
    %c0_i32_0 = arith.constant 0 : i32
    %c0_i32_1 = arith.constant 0 : i32
    return %c0_i32, %c0_i32_0 : i32, i32
  }
  func.func @transform_5(%arg0: i32) -> (i32, i32) {
    %c0_i32 = arith.constant 0 : i32
    %c0_i32_0 = arith.constant 0 : i32
    %c0_i32_1 = arith.constant 0 : i32
    return %c0_i32, %c0_i32_0 : i32, i32
  }
  func.func @transform_6(%arg0: i32) -> (i32, i32) {
    %c0_i32 = arith.constant 0 : i32
    %c0_i32_0 = arith.constant 0 : i32
    return %arg0, %c0_i32 : i32, i32
  }
}

</mosaic_0001>

<bundles_post_ra>
// kernel: tpu_custom_call.1
= control target key start
LH: loop header
LB: loop body
LE: loop exit
PB: predicated region body
PF: predicated region fallthrough
CT: control target
= control target key end

     0   :  { %vm79_vm0 = vcmask 1043456   ;;  %vm27_vm1 = vcmask 130048   ;;  %vm126_vm2 = vcmask 1041408   ;;  %vm72_vm3 = vcmask 818176   ;;  %s337_s2 = inlined_call_operand.vmem [shape: f32[16,100], index: 2, kind: input, shape index: {}]   ;;  %s338_s0 = inlined_call_operand.vmem [shape: f32[8,16], index: 0, kind: input, shape index: {}]   ;;  %s339_s3 = inlined_call_operand.vmem [shape: f32[100,50], index: 3, kind: input, shape index: {}]   ;;  %s340_s1 = inlined_call_operand.vmem [shape: f32[8,16], index: 1, kind: input, shape index: {}]   ;;  %s341_s4 = inlined_call_operand.vmem [shape: f32[50,1], index: 4, kind: input, shape index: {}]   ;;  %s342_s5 = inlined_call_operand.vmem [shape: f32[50,1], index: 5, kind: input, shape index: {}]   ;;  %s343_s6 = inlined_call_operand.vmem [shape: f32[8,1], index: 6, kind: output, shape index: {}]  }
   0x1   :  { %v26_v0 = vld [vmem:[%s337_s2 + $0x8] sm:$0xff]  ;;  %v25_v1 = vld [vmem:[%s337_s2] sm:$0xff]  ;;  %v70_v4 = vld [vmem:[%s339_s3 + $0x58] sm:$0xff]  ;;  %vm122_vm4 = vcmask 408576   ;;  %vm176_vm5 = vcmask 7168  }
   0x2   :  { %48 = vmatpush.msra.mxu2 %v26_v0  ;;  %v23_v2 = vld [vmem:[%s338_s0] sm:$0xff]  ;;  %v69_v5 = vld [vmem:[%s339_s3 + $0x50] sm:$0xff]  ;;  %v68_v6 = vld [vmem:[%s339_s3 + $0x48] sm:$0xff] }
   0x3   :  { %v71_v3 = vld [vmem:[%s339_s3 + $0x60] sm:$0xf]  ;;  %v66_v9 = vld [vmem:[%s339_s3 + $0x38] sm:$0xff]  ;;  %v65_v10 = vld [vmem:[%s339_s3 + $0x30] sm:$0xff] }
   0x4   :  { %184 = vmatpush.msk.msra.mxu0 %vm79_vm0, %v71_v3  ;;  %191 = vmatpush.msk.msra.mxu1 %vm79_vm0, %v71_v3  ;;  %v67_v7 = vld [vmem:[%s339_s3 + $0x40] sm:$0xff]  ;;  %v64_v11 = vld [vmem:[%s339_s3 + $0x28] sm:$0xff]  ;;  %v62_v13 = vld [vmem:[%s339_s3 + $0x18] sm:$0xff] }
   0x5   :  { %49 = vmatpush.msra.mxu2 %v25_v1  ;;  %v24_v8 = vld [vmem:[%s340_s1] sm:$0xff]  ;;  %v61_v14 = vld [vmem:[%s339_s3 + $0x10] sm:$0xff]  ;;  %v60_v15 = vld [vmem:[%s339_s3 + $0x8] sm:$0xff] }
   0x6   :  { %182 = vmatmul.msk.f32.vlgmr.msra.gmra.mxu2 %vm27_vm1, %v23_v2  ;;  %87 = vmatpush.msra.mxu0 %v70_v4  ;;  %v63_v12 = vld [vmem:[%s339_s3 + $0x20] sm:$0xff]  ;;  %v114_v17 = vld [vmem:[%s341_s4 + $0x30] sm:$0x3]  ;;  %v113_v18 = vld [vmem:[%s341_s4 + $0x28] sm:$0xff] }
   0x7   :  { %192 = vmatpush.msra.mxu1 %v70_v4  ;;  %v59_v16 = vld [vmem:[%s339_s3] sm:$0xff]  ;;  %189 = vmatpush.msk.msra.mxu3 %vm126_vm2, %v114_v17  ;;  %v121_v19 = vld [vmem:[%s342_s5 + $0x30] sm:$0x3]  ;;  %v120_v20 = vld [vmem:[%s342_s5 + $0x28] sm:$0xff] }
   0x8   :  { %88 = vmatpush.msra.mxu0 %v69_v5  ;;  %v112_v21 = vld [vmem:[%s341_s4 + $0x20] sm:$0xff]  ;;  %187 = vmatpush.msk.msrb.mxu2 %vm126_vm2, %v121_v19  ;;  %v111_v22 = vld [vmem:[%s341_s4 + $0x18] sm:$0xff]  ;;  %v110_v23 = vld [vmem:[%s341_s4 + $0x10] sm:$0xff] }
   0x9   :  { %193 = vmatpush.msra.mxu1 %v69_v5  ;;  %166 = vmatpush.msra.mxu3 %v113_v18  ;;  %v109_v28 = vld [vmem:[%s341_s4 + $0x8] sm:$0xff]  ;;  %v119_v29 = vld [vmem:[%s342_s5 + $0x20] sm:$0xff]  ;;  %v118_v30 = vld [vmem:[%s342_s5 + $0x18] sm:$0xff] }
   0xa   :  { %89 = vmatpush.msra.mxu0 %v68_v6  ;;  %140 = vmatpush.msrb.mxu2 %v120_v20  ;;  %v108_v31 = vld [vmem:[%s341_s4] sm:$0xff]  ;;  %v117_v32 = vld [vmem:[%s342_s5 + $0x10] sm:$0xff]  ;;  %v116_v33 = vld [vmem:[%s342_s5 + $0x8] sm:$0xff] }
   0xb   :  { %194 = vmatpush.msra.mxu1 %v68_v6  ;;  %167 = vmatpush.msra.mxu3 %v112_v21  ;;  %v115_v34 = vld [vmem:[%s342_s5] sm:$0xff] }
   0xc   :  { %90 = vmatpush.msra.mxu0 %v67_v7  ;;  %141 = vmatpush.msrb.mxu2 %v119_v29 }
   0xd   :  { %195 = vmatpush.msra.mxu1 %v67_v7  ;;  %168 = vmatpush.msra.mxu3 %v111_v22 }
   0xe   :  { %183 = vmatmul.msk.f32.gmra.mxu2 %vm27_vm1, %v24_v8  ;;  %91 = vmatpush.msra.mxu0 %v66_v9 }
   0xf   :  { %196 = vmatpush.msra.mxu1 %v66_v9  ;;  %169 = vmatpush.msra.mxu3 %v110_v23 }
  0x10   :  { %92 = vmatpush.msra.mxu0 %v65_v10  ;;  %142 = vmatpush.msrb.mxu2 %v118_v30 }
  0x11   :  { %197 = vmatpush.msra.mxu1 %v65_v10  ;;  %170 = vmatpush.msra.mxu3 %v109_v28 }
  0x12   :  { %93 = vmatpush.msra.mxu0 %v64_v11  ;;  %143 = vmatpush.msrb.mxu2 %v117_v32 }
  0x13   :  { %198 = vmatpush.msra.mxu1 %v64_v11  ;;  %171 = vmatpush.msra.mxu3 %v108_v31 }
  0x14   :  { %94 = vmatpush.msra.mxu0 %v63_v12  ;;  %144 = vmatpush.msrb.mxu2 %v116_v33 }
  0x15   :  { %199 = vmatpush.msra.mxu1 %v63_v12 }
  0x16   :  { %95 = vmatpush.msra.mxu0 %v62_v13  ;;  %145 = vmatpush.msrb.mxu2 %v115_v34 }
  0x17   :  { %200 = vmatpush.msra.mxu1 %v62_v13 }
  0x18   :  { %96 = vmatpush.msra.mxu0 %v61_v14 }
  0x19   :  { %201 = vmatpush.msra.mxu1 %v61_v14 }
  0x1a   :  { %97 = vmatpush.msra.mxu0 %v60_v15 }
  0x1b   :  { %202 = vmatpush.msra.mxu1 %v60_v15 }
  0x1c   :  { %98 = vmatpush.msra.mxu0 %v59_v16 }
  0x1d   :  { %203 = vmatpush.msra.mxu1 %v59_v16 }
  0x89   :  { %v51_v24 = vpop.f32.mrf.mxu2 }
  0x8a   :  { %v57_v25 = vmax.f32 %v51_v24, 0.0 }
  0x8c   :  { %185 = vmatmul.msk.f32.vlgmr.msra.gmra.mxu0 %vm72_vm3, %v57_v25 }
  0x91   :  { %v54_v26 = vpop.f32.mrf.mxu2 }
  0x92   :  { %v58_v27 = vmax.f32 %v54_v26, 0.0 }
  0x94   :  { %186 = vmatmul.msk.f32.vlgmr.msra.gmra.mxu1 %vm72_vm3, %v58_v27 }
 0x109   :  { %v100_v35 = vpop.f32.mrf.mxu0 }
 0x10a   :  { %v106_v36 = vmax.f32 %v100_v35, 0.0 }
 0x10c   :  { %190 = vmatmul.msk.f32.vlgmr.msra.gmra.mxu3 %vm122_vm4, %v106_v36 }
 0x111   :  { %v103_v37 = vpop.f32.mrf.mxu1 }
 0x112   :  { %v107_v38 = vmax.f32 %v103_v37, 0.0 }
 0x114   :  { %188 = vmatmul.msk.f32.vlgmr.msrb.gmra.mxu2 %vm122_vm4, %v107_v38 }
 0x18f   :  { %v173_v39 = vpop.f32.mrf.mxu3 }
 0x197   :  { %v147_v40 = vpop.f32.mrf.mxu2 }
 0x198   :  { %v174_v41 = vadd.f32 %v173_v39, %v147_v40 }
 0x19a   :  { %177 = vst.msk [vmem:[%s343_s6] sm:$0xff] %vm176_vm5, %v174_v41 }

</bundles_post_ra>
